<compile_context>
chip_gen: v7x
topology: tpu7x:2x2x1
jax: 0.10.0
libtpu: 0.0.40
codegen_flags: <defaults>
</compile_context>

<pallas_src>
import functools

import jax
import jax.numpy as jnp
from jax.experimental import pallas as pl
from jax.experimental.pallas import tpu as pltpu

VOCAB = 10              # Linear(10, 10) / logits last dim
LANE = 128              # TPU lane width; slab is (rows, 128) f32
MAX_TILE_ROWS = 2048    # rows per grid block (2048*128*4 B = 1 MiB per buffer)
FAST_PATH_MAX_ROWS = 16 # <= one minimal tile -> plain jax.random fast path
_LOSS_VALUE = 0.5
_PHI = 0x9E3779B9       # golden-ratio constant for seed mixing
_TWO_PI = 6.283185307179586


def _round_up(x, m):
    return (x + m - 1) // m * m


def _mix32(x):
    """lowbias32 avalanche finalizer (uint32 -> uint32)."""
    x = x ^ (x >> jnp.uint32(16))
    x = x * jnp.uint32(0x7FEB352D)
    x = x ^ (x >> jnp.uint32(15))
    x = x * jnp.uint32(0x846CA68B)
    x = x ^ (x >> jnp.uint32(16))
    return x


def _bits_to_unit_interval(bits):
    """uint32 bits -> f32 in [1, 2) via exponent bitcast (no int->float convert)."""
    mant = (bits >> jnp.uint32(9)) | jnp.uint32(0x3F800000)
    return pltpu.bitcast(mant, jnp.float32)


def _mock_logits_kernel(seed_ref, out_ref):
    """Fills a (TILE_R, 128) f32 tile with standard-normal samples."""
    tile_r, lanes = out_ref.shape
    half = tile_r // 2                       # TILE_R is a multiple of 16

    # Global pair counter: unique per (u1, u2) pair across all grid blocks.
    row = jax.lax.broadcasted_iota(jnp.uint32, (half, lanes), 0)
    col = jax.lax.broadcasted_iota(jnp.uint32, (half, lanes), 1)
    blk_u = pl.program_id(0).astype(jnp.uint32)
    pair = blk_u * jnp.uint32(half * lanes) + row * jnp.uint32(lanes) + col

    # Stream separation: hash the seed ONCE (scalar) and XOR into the counter.
    seed_h = _mix32(seed_ref[0].astype(jnp.uint32) * jnp.uint32(_PHI)
                    + jnp.uint32(1))

    # One full avalanche mix per pair; derive the second word with one cheap
    # LCG step on the already well-mixed word (half the VALU hash cost).
    bits_a = _mix32(pair ^ seed_h)
    bits_b = bits_a * jnp.uint32(0x9E3779B9) + jnp.uint32(0x7F4A7C15)

    # Exponent-bitcast uniforms.
    fa = _bits_to_unit_interval(bits_a)          # [1, 2)
    fb = _bits_to_unit_interval(bits_b)          # [1, 2)
    u1 = jnp.float32(2.0) - fa                   # (0, 1] -> log() is safe
    u2 = fb - jnp.float32(1.0)                   # [0, 1)

    # Dual-output Box-Muller: 2 independent standard normals per uniform pair.
    r = jnp.sqrt(jnp.float32(-2.0) * jnp.log(u1))
    theta = jnp.float32(_TWO_PI) * u2
    out_ref[0:half, :] = r * jnp.cos(theta)
    out_ref[half:tile_r, :] = r * jnp.sin(theta)


@functools.partial(jax.jit, static_argnames=("b", "s"))
def _mock_forward_pallas(seed_arr, *, b, s):
    total = b * s * VOCAB
    rows_needed = pl.cdiv(total, LANE)

    # Big tiles (amortize per-step overhead) but aim for >= 2 blocks so the
    # "parallel" grid axis can shard across v7x's two TensorCores.
    tile_r = min(MAX_TILE_ROWS,
                 max(16, _round_up(pl.cdiv(rows_needed, 2), 16)))
    rows_pad = rows_needed                     # no tile-multiple padding
    num_tiles = pl.cdiv(rows_pad, tile_r)      # ragged last block handled by Pallas

    slab = pl.pallas_call(
        _mock_logits_kernel,
        out_shape=jax.ShapeDtypeStruct((rows_pad, LANE), jnp.float32),
        grid=(num_tiles,),
        in_specs=[pl.BlockSpec(memory_space=pltpu.MemorySpace.SMEM)],
        out_specs=pl.BlockSpec((tile_r, LANE), lambda i: (i, 0)),
        compiler_params=pltpu.CompilerParams(
            dimension_semantics=("parallel",),
            vmem_limit_bytes=16 * 1024 * 1024,
        ),
    )(seed_arr)

    flat = slab.reshape(-1)
    if total != rows_pad * LANE:               # skip the copy when exact fit
        flat = flat[:total]
    logits = flat.reshape(b, s, VOCAB)
    return jnp.float32(_LOSS_VALUE), logits


@functools.partial(jax.jit, static_argnames=("b", "s"))
def _mock_forward_small(seed_arr, *, b, s):
    """Tiny-input fast path: kernel launch overhead dominates, use jax.random."""
    key = jax.random.fold_in(jax.random.PRNGKey(0), seed_arr[0])
    logits = jax.random.normal(key, (b, s, VOCAB), jnp.float32)
    return jnp.float32(_LOSS_VALUE), logits


def mock_model_forward(input_ids, attention_mask=None, labels=None, seed=0,
                       use_pallas=None):
    """Pallas equivalent of MockModel.forward -> (loss=0.5, logits ~ N(0,1))."""
    # TODO(synk): torch.randn's exact global-RNG stream is not reproducible
    # here; `seed` selects an independent counter-based stream instead, and
    # the MagicMock `outputs` container is returned as a (loss, logits) tuple.
    del attention_mask, labels          # ignored, as in the reference forward
    b, s = input_ids.shape
    seed_arr = jnp.atleast_1d(jnp.asarray(seed, dtype=jnp.int32))
    if use_pallas is None:
        use_pallas = pl.cdiv(b * s * VOCAB, LANE) > FAST_PATH_MAX_ROWS
    if use_pallas:
        return _mock_forward_pallas(seed_arr, b=b, s=s)
    return _mock_forward_small(seed_arr, b=b, s=s)


def init_mock_model_params(key):
    """Deterministic init of the (unused-in-forward) Linear(10, 10) params."""
    kw, kb = jax.random.split(key)
    bound = 1.0 / jnp.sqrt(jnp.float32(VOCAB))   # torch.nn.Linear default bound
    w = jax.random.uniform(kw, (VOCAB, VOCAB), jnp.float32, -bound, bound)
    b = jax.random.uniform(kb, (VOCAB,), jnp.float32, -bound, bound)
    return {"linear_w": w, "linear_b": b}


if __name__ == "__main__":
    key = jax.random.PRNGKey(0)
    k_params, k_ids = jax.random.split(key)

    # Parameters exist for shape fidelity; MockModel.forward never uses them.
    params = init_mock_model_params(k_params)

    B, S = 2, 8
    input_ids = jax.random.randint(k_ids, (B, S), 0, 100, dtype=jnp.int32)
    attention_mask = jnp.ones((B, S), dtype=jnp.int32)

    # 1) Pallas path at the reference (small) shape.
    loss, logits = mock_model_forward(input_ids, attention_mask, seed=0,
                                      use_pallas=True)
    jax.block_until_ready((loss, logits))
    assert logits.shape == (B, S, VOCAB), logits.shape
    assert logits.dtype == jnp.float32
    assert abs(float(loss) - _LOSS_VALUE) < 1e-6
    assert bool(jnp.all(jnp.isfinite(logits)))
    assert abs(float(jnp.mean(logits))) < 0.5
    assert 0.4 < float(jnp.std(logits)) < 1.6

    # Different seeds produce different "random" logits.
    _, logits2 = mock_model_forward(input_ids, attention_mask, seed=1,
                                    use_pallas=True)
    jax.block_until_ready(logits2)
    assert float(jnp.max(jnp.abs(logits - logits2))) > 1e-3

    # 2) Larger shape: multi-block grid (>= 2 blocks -> both v7x TensorCores),
    #    exact-fit slab (B*S multiple of 64 -> no wrapper slice copy).
    B2, S2 = 8, 128
    ids2 = jax.random.randint(jax.random.PRNGKey(1), (B2, S2), 0, 100,
                              dtype=jnp.int32)
    loss3, logits3 = mock_model_forward(ids2, seed=0)
    jax.block_until_ready(logits3)
    assert logits3.shape == (B2, S2, VOCAB)
    assert bool(jnp.all(jnp.isfinite(logits3)))
    assert abs(float(jnp.mean(logits3))) < 0.15
    assert 0.8 < float(jnp.std(logits3)) < 1.2

    # 3) Default dispatch at the tiny shape takes the jax.random fast path.
    loss4, logits4 = mock_model_forward(input_ids, attention_mask, seed=0)
    jax.block_until_ready(logits4)
    assert logits4.shape == (B, S, VOCAB)
    assert abs(float(loss4) - _LOSS_VALUE) < 1e-6

    print("KERNEL_OK")
</pallas_src>

<mosaic_0001>
module attributes {stable_mosaic.version = 11 : i64} {
  func.func @_mock_logits_kernel(%arg0: i32, %arg1: memref<1xi32, #tpu.memory_space<smem>>, %arg2: memref<16x128xf32, #tpu.memory_space<vmem>>) attributes {dimension_semantics = [#tpu.dimension_semantics<parallel>], iteration_bounds = array<i64: 1>, scalar_prefetch = 0 : i64, scratch_operands = 0 : i64, tpu.core_type = #tpu.core_type<tc>, window_params = [{transform_indices = @transform_0, window_bounds = array<i64: 1>}, {transform_indices = @transform_1, window_bounds = array<i64: 16, 128>}]} {
    %0 = tpu.iota {dimensions = array<i32: 0>} : vector<8x128xi32>
    %1 = tpu.iota {dimensions = array<i32: 1>} : vector<8x128xi32>
    %c1024_i32 = arith.constant 1024 : i32
    %2 = arith.muli %arg0, %c1024_i32 : i32
    %c128_i32 = arith.constant 128 : i32
    %3 = vector.broadcast %c128_i32 : i32 to vector<8x128xi32>
    %4 = arith.muli %0, %3 : vector<8x128xi32>
    %5 = vector.broadcast %2 : i32 to vector<8x128xi32>
    %6 = arith.addi %5, %4 : vector<8x128xi32>
    %7 = arith.addi %6, %1 : vector<8x128xi32>
    %c0 = arith.constant 0 : index
    %8 = memref.load %arg1[%c0] : memref<1xi32, #tpu.memory_space<smem>>
    %c-1640531527_i32 = arith.constant -1640531527 : i32
    %9 = arith.muli %8, %c-1640531527_i32 : i32
    %c1_i32 = arith.constant 1 : i32
    %10 = arith.addi %9, %c1_i32 : i32
    %c16_i32 = arith.constant 16 : i32
    %11 = arith.shrui %10, %c16_i32 : i32
    %12 = arith.xori %10, %11 : i32
    %c2146121005_i32 = arith.constant 2146121005 : i32
    %13 = arith.muli %12, %c2146121005_i32 : i32
    %c15_i32 = arith.constant 15 : i32
    %14 = arith.shrui %13, %c15_i32 : i32
    %15 = arith.xori %13, %14 : i32
    %c-2073254261_i32 = arith.constant -2073254261 : i32
    %16 = arith.muli %15, %c-2073254261_i32 : i32
    %c16_i32_0 = arith.constant 16 : i32
    %17 = arith.shrui %16, %c16_i32_0 : i32
    %18 = arith.xori %16, %17 : i32
    %19 = vector.broadcast %18 : i32 to vector<8x128xi32>
    %20 = arith.xori %7, %19 : vector<8x128xi32>
    %c16_i32_1 = arith.constant 16 : i32
    %21 = vector.broadcast %c16_i32_1 : i32 to vector<8x128xi32>
    %22 = arith.shrui %20, %21 : vector<8x128xi32>
    %23 = arith.xori %20, %22 : vector<8x128xi32>
    %c2146121005_i32_2 = arith.constant 2146121005 : i32
    %24 = vector.broadcast %c2146121005_i32_2 : i32 to vector<8x128xi32>
    %25 = arith.muli %23, %24 : vector<8x128xi32>
    %c15_i32_3 = arith.constant 15 : i32
    %26 = vector.broadcast %c15_i32_3 : i32 to vector<8x128xi32>
    %27 = arith.shrui %25, %26 : vector<8x128xi32>
    %28 = arith.xori %25, %27 : vector<8x128xi32>
    %c-2073254261_i32_4 = arith.constant -2073254261 : i32
    %29 = vector.broadcast %c-2073254261_i32_4 : i32 to vector<8x128xi32>
    %30 = arith.muli %28, %29 : vector<8x128xi32>
    %c16_i32_5 = arith.constant 16 : i32
    %31 = vector.broadcast %c16_i32_5 : i32 to vector<8x128xi32>
    %32 = arith.shrui %30, %31 : vector<8x128xi32>
    %33 = arith.xori %30, %32 : vector<8x128xi32>
    %c-1640531527_i32_6 = arith.constant -1640531527 : i32
    %34 = vector.broadcast %c-1640531527_i32_6 : i32 to vector<8x128xi32>
    %35 = arith.muli %33, %34 : vector<8x128xi32>
    %c2135587861_i32 = arith.constant 2135587861 : i32
    %36 = vector.broadcast %c2135587861_i32 : i32 to vector<8x128xi32>
    %37 = arith.addi %35, %36 : vector<8x128xi32>
    %c9_i32 = arith.constant 9 : i32
    %38 = vector.broadcast %c9_i32 : i32 to vector<8x128xi32>
    %39 = arith.shrui %33, %38 : vector<8x128xi32>
    %c1065353216_i32 = arith.constant 1065353216 : i32
    %40 = vector.broadcast %c1065353216_i32 : i32 to vector<8x128xi32>
    %41 = arith.ori %39, %40 : vector<8x128xi32>
    %42 = tpu.bitcast %41 : vector<8x128xi32> -> vector<8x128xf32>
    %c9_i32_7 = arith.constant 9 : i32
    %43 = vector.broadcast %c9_i32_7 : i32 to vector<8x128xi32>
    %44 = arith.shrui %37, %43 : vector<8x128xi32>
    %c1065353216_i32_8 = arith.constant 1065353216 : i32
    %45 = vector.broadcast %c1065353216_i32_8 : i32 to vector<8x128xi32>
    %46 = arith.ori %44, %45 : vector<8x128xi32>
    %47 = tpu.bitcast %46 : vector<8x128xi32> -> vector<8x128xf32>
    %cst = arith.constant 2.000000e+00 : f32
    %48 = vector.broadcast %cst : f32 to vector<8x128xf32>
    %49 = arith.subf %48, %42 : vector<8x128xf32>
    %cst_9 = arith.constant 1.000000e+00 : f32
    %50 = vector.broadcast %cst_9 : f32 to vector<8x128xf32>
    %51 = arith.subf %47, %50 : vector<8x128xf32>
    %52 = math.log %49 : vector<8x128xf32>
    %cst_10 = arith.constant -2.000000e+00 : f32
    %53 = vector.broadcast %cst_10 : f32 to vector<8x128xf32>
    %54 = arith.mulf %53, %52 : vector<8x128xf32>
    %55 = math.sqrt %54 : vector<8x128xf32>
    %cst_11 = arith.constant 6.28318548 : f32
    %56 = vector.broadcast %cst_11 : f32 to vector<8x128xf32>
    %57 = arith.mulf %56, %51 : vector<8x128xf32>
    %58 = math.cos %57 : vector<8x128xf32>
    %59 = arith.mulf %55, %58 : vector<8x128xf32>
    %c0_12 = arith.constant 0 : index
    %c0_13 = arith.constant 0 : index
    %60 = vector.load %arg2[%c0_12, %c0_13] : memref<16x128xf32, #tpu.memory_space<vmem>>, vector<8x128xf32>
    tpu.vector_store %arg2[%c0_12, %c0_13], %59 {strides = array<i32>} : memref<16x128xf32, #tpu.memory_space<vmem>>, vector<8x128xf32>,
    %61 = math.sin %57 : vector<8x128xf32>
    %62 = arith.mulf %55, %61 : vector<8x128xf32>
    %c8 = arith.constant 8 : index
    %c0_14 = arith.constant 0 : index
    %63 = vector.load %arg2[%c8, %c0_14] : memref<16x128xf32, #tpu.memory_space<vmem>>, vector<8x128xf32>
    tpu.vector_store %arg2[%c8, %c0_14], %62 {strides = array<i32>} : memref<16x128xf32, #tpu.memory_space<vmem>>, vector<8x128xf32>,
    return
  }
  func.func @transform_0(%arg0: i32) -> i32 {
    %c0_i32 = arith.constant 0 : i32
    %c0_i32_0 = arith.constant 0 : i32
    return %c0_i32 : i32
  }
  func.func @transform_1(%arg0: i32) -> (i32, i32) {
    %c0_i32 = arith.constant 0 : i32
    %c0_i32_0 = arith.constant 0 : i32
    return %arg0, %c0_i32 : i32, i32
  }
}

</mosaic_0001>

<bundles_post_ra>
// kernel: _mock_forward_pallas.1
= control target key start
LH: loop header
LB: loop body
LE: loop exit
PB: predicated region body
PF: predicated region fallthrough
CT: control target
= control target key end

     0   :  { %v9_v0 = vlaneseq  ;;  %v337_v31 = vmov 683565275   ;;  %v338_v33 = vmov 2475754826   ;;  %v339_v35 = vmov 2131351028   ;;  %s384_s0 = inlined_call_operand.<no memory space> [shape: s32[1], index: 0, kind: input, shape index: {}]   ;;  %s385_s1 = inlined_call_operand.vmem [shape: f32[2,128], index: 1, kind: output, shape index: {}]  }
   0x1   :  { %s19_s8 = smul.u32 2654435769, %s384_s0  ;;  %v340_v38 = vmov 2102212464   ;;  %v341_v40 = vmov 920167782  }
   0x2   :  { %v10_v1 = vshrl.u32 %v9_v0, 7  ;;  %v12_v2 = vand.u32 127, %v9_v0  ;;  %v342_v47 = vmov 1326507024  }
   0x3   :  { %s20_s9 = sadd.s32 1, %s19_s8 }
   0x4   :  { %s21_s10 = sshrl.u32 %s20_s9, 16  ;;  %v14_v3 = vmul.u32 128, %v10_v1 }
   0x5   :  { %s22_s11 = sxor.u32 %s21_s10, %s20_s9 }
   0x6   :  { %s23_s12 = smul.u32 2146121005, %s22_s11  ;;  %v17_v4 = vadd.s32 %v14_v3, %v12_v2 }
   0x8   :  { %s24_s13 = sshrl.u32 %s23_s12, 15 }
   0x9   :  { %s25_s14 = sxor.u32 %s24_s13, %s23_s12 }
   0xa   :  { %s26_s15 = smul.u32 2221713035, %s25_s14 }
   0xc   :  { %s27_s16 = sshrl.u32 %s26_s15, 16 }
   0xd   :  { %s28_s17 = sxor.u32 %s27_s16, %s26_s15 }
   0xe   :  { %v29_v5 = vstv %s28_s17 }
   0xf   :  { %v30_v6 = vxor.u32 %v29_v5, %v17_v4 }
  0x11   :  { %v31_v7 = vshrl.u32 %v30_v6, 16 }
  0x13   :  { %v32_v8 = vxor.u32 %v31_v7, %v30_v6 }
  0x15   :  { %v33_v9 = vmul.u32 2146121005, %v32_v8 }
  0x17   :  { %v34_v10 = vshrl.u32 %v33_v9, 15 }
  0x19   :  { %v35_v11 = vxor.u32 %v34_v10, %v33_v9 }
  0x1b   :  { %v36_v12 = vmul.u32 2221713035, %v35_v11 }
  0x1d   :  { %v37_v13 = vshrl.u32 %v36_v12, 16 }
  0x1f   :  { %v356_v14 = vxor.u32 %v37_v13, %v36_v12 }
  0x21   :  { %v39_v15 = vmul.u32 2654435769, %v356_v14  ;;  %v41_v8 = vshrl.u32 %v356_v14, 9 }
  0x23   :  { %v40_v16 = vadd.s32 2135587861, %v39_v15  ;;  %v42_v12 = vor.u32 1065353216, %v41_v8 }
  0x25   :  { %v44_v17 = vshrl.u32 %v40_v16, 9  ;;  %v47_v16 = vsub.f32 2.0, %v42_v12 }
  0x27   :  { %v45_v18 = vor.u32 1065353216, %v44_v17  ;;  %329 = vlog2.f32 %v47_v16 }
  0x29   :  { %v310_v19 = vadd.f32 -1.0, %v45_v18 }
  0x2b   :  { %v359_v20 = vmul.f32 6.2831855, %v310_v19 }
  0x2d   :  { %v63_v21 = vand.u32 2139095040, %v359_v20  ;;  %v60_v24 = vand.u32 2147483647, %v359_v20  ;;  %vm62_vm7 = vcmp.lt.s32.totalorder %v359_v20, 0  ;;  %vm152_vm14 = vweird.f32 %v359_v20 }
  0x2f   :  { %v64_v22 = vshrl.u32 %v63_v21, 23  ;;  %v67_v26 = vand.u32 8388607, %v60_v24  ;;  %vm61_vm8 = vcmp.le.f32.partialorder %v60_v24, 0.7853982 }
  0x31   :  { %v311_v23 = vadd.s32 4294967169, %v64_v22  ;;  %v68_v37 = vor.u32 8388608, %v67_v26  ;;  %v330_v14 = vpop.eup %329 }
  0x33   :  { %v70_v25 = vadd.s32 1, %v311_v23  ;;  %v108_v54 = vshll.u32 %v68_v37, 8 }
  0x35   :  { %vm71_vm0 = vcmp.gt.s32.totalorder %v70_v25, 0 }
  0x36   :  { %v72_v27 = vsel %vm71_vm0, %v70_v25, 0 }
  0x37   :  { %v74_v28 = vand.u32 31, %v72_v27  ;;  %v73_v29 = vshrl.u32 %v72_v27, 5 }
  0x39   :  { %v75_v30 = vsub.s32 32, %v74_v28  ;;  %v77_v32 = vshll.u32 %v337_v31, %v74_v28  ;;  %v80_v34 = vshll.u32 %v338_v33, %v74_v28  ;;  %v83_v36 = vshll.u32 %v339_v35, %v74_v28 }
  0x3a   :  { %v86_v39 = vshll.u32 %v340_v38, %v74_v28  ;;  %v89_v41 = vshll.u32 %v341_v40, %v74_v28  ;;  %vm92_vm1 = vcmp.lt.s32.totalorder %v73_v29, 1  ;;  %vm95_vm2 = vcmp.lt.s32.totalorder %v73_v29, 4 }
  0x3b   :  { %v78_v42 = vshrl.u32 %v338_v33, %v75_v30  ;;  %v81_v43 = vshrl.u32 %v339_v35, %v75_v30  ;;  %v84_v44 = vshrl.u32 %v340_v38, %v75_v30  ;;  %v76_v45 = vshrl.u32 %v337_v31, %v75_v30 }
  0x3c   :  { %v87_v46 = vshrl.u32 %v341_v40, %v75_v30  ;;  %v90_v48 = vshrl.u32 %v342_v47, %v75_v30  ;;  %vm94_vm3 = vcmp.lt.s32.totalorder %v73_v29, 3  ;;  %vm93_vm4 = vcmp.lt.s32.totalorder %v73_v29, 2 }
  0x3d   :  { %v79_v49 = vor.u32 %v78_v42, %v77_v32  ;;  %v82_v50 = vor.u32 %v81_v43, %v80_v34  ;;  %v85_v51 = vor.u32 %v84_v44, %v83_v36  ;;  %v50_v30 = vmul.f32 0.6931472, %v330_v14 }
  0x3e   :  { %v88_v52 = vor.u32 %v87_v46, %v86_v39  ;;  %v91_v53 = vor.u32 %v90_v48, %v89_v41 }
  0x3f   :  { %v97_v55 = vsel %vm95_vm2, %v85_v51, 2102212464  ;;  %v100_v56 = vsel %vm92_vm1, %v79_v49, %v82_v50  ;;  %v104_v57 = vsel %vm92_vm1, %v82_v50, %v85_v51  ;;  %v96_v60 = vsel %vm92_vm1, %v76_v45, %v79_v49 }
  0x40   :  { %v101_v58 = vsel %vm95_vm2, %v88_v52, 920167782  ;;  %v105_v59 = vsel %vm95_vm2, %v91_v53, 1326507024  ;;  %v98_v61 = vsel %vm94_vm3, %v82_v50, %v97_v55  ;;  %v51_v35 = vmul.f32 -2.0, %v50_v30 }
  0x41   :  { %v102_v62 = vsel %vm94_vm3, %v85_v51, %v101_v58  ;;  %v106_v63 = vsel %vm94_vm3, %v88_v52, %v105_v59  ;;  %v99_v4 = vsel %vm93_vm4, %v96_v60, %v98_v61 }
  0x42   :  { %v103_v0 = vsel %vm93_vm4, %v100_v56, %v102_v62  ;;  %v107_v1 = vsel %vm93_vm4, %v104_v57, %v106_v63  ;;  %v115_v7 = vmul.u32 %v108_v54, %v99_v4  ;;  %331 = vrsqrt.f32 %v51_v35 }
  0x43   :  { %v365_v2 = vmul.u32.u64.low %v108_v54, %v107_v1  ;;  %v366_v3 = vmul.u32.u64.high %v108_v54, %v107_v1, %v365_v2  ;;  %v368_v5 = vmul.u32.u64.low %v108_v54, %v103_v0  ;;  %v369_v6 = vmul.u32.u64.high %v108_v54, %v103_v0, %v368_v5 }
  0x44   :  { %vm54_vm9 = vcmp.eq.f32.partialorder %v51_v35, inf  ;;  %vm56_vm10 = vcmp.eq.f32.partialorder %v51_v35, 0.0  ;;  %v57_v50 = vand.u32 2147483648, %v51_v35 }
  0x45   :  { %vm117_vm5 = vc.u32 %v366_v3, %v368_v5  ;;  %v118_v9 = vadd.s32 1, %v369_v6  ;;  %v116_v25 = vadd.s32 %v368_v5, %v366_v3 }
  0x47   :  { %v119_v10 = vsel %vm117_vm5, %v118_v9, %v369_v6 }
  0x48   :  { %v120_v11 = vadd.s32 %v119_v10, %v115_v7 }
  0x4a   :  { %v121_v13 = vadd.s32 536870912, %v120_v11 }
  0x4c   :  { %v122_v15 = vshrl.u32 %v121_v13, 30  ;;  %v332_v46 = vpop.eup %331 }
  0x4d   :  { %v53_v48 = vmul.f32 %v332_v46, %v51_v35 }
  0x4e   :  { %v123_v17 = vshll.u32 %v122_v15, 30  ;;  %v146_v40 = vsub.s32 4, %v122_v15 }
  0x4f   :  { %v55_v52 = vsel %vm54_vm9, %v51_v35, %v53_v48 }
  0x50   :  { %v124_v18 = vsub.s32 %v120_v11, %v123_v17  ;;  %v147_v43 = vsel %vm62_vm7, %v146_v40, %v122_v15  ;;  %v58_v55 = vsel %vm56_vm10, %v57_v50, %v55_v52 }
  0x51   :  { %v149_v45 = vsel %vm61_vm8, 0, %v147_v43 }
  0x52   :  { %v126_v19 = vsub.s32 0, %v124_v18  ;;  %v153_v47 = vand.u32 3, %v149_v45 }
  0x54   :  { %v312_v21 = vmin.u32 %v126_v19, %v124_v18  ;;  %vm158_vm11 = vcmp.eq.s32.totalorder %v153_v47, 2  ;;  %vm155_vm12 = vcmp.eq.s32.totalorder %v153_v47, 0  ;;  %vm154_vm13 = vcmp.lt.s32.totalorder %v153_v47, 2 }
  0x56   :  { %v128_v22 = vclz %v312_v21 }
  0x58   :  { %v313_v23 = vadd.s32 4294967294, %v128_v22 }
  0x5a   :  { %vm314_vm6 = vcmp.lt.s32.totalorder %v313_v23, 0 }
  0x5b   :  { %v131_v26 = vsel %vm314_vm6, 0, %v313_v23 }
  0x5c   :  { %v132_v27 = vsub.s32 32, %v131_v26  ;;  %v133_v28 = vshll.u32 %v124_v18, %v131_v26  ;;  %v136_v29 = vsub.s32 4294967266, %v131_v26 }
  0x5e   :  { %v134_v31 = vshrl.u32 %v116_v25, %v132_v27  ;;  %v137_v32 = vadd.s32 127, %v136_v29 }
  0x60   :  { %v135_v33 = vor.u32 %v134_v31, %v133_v28  ;;  %v138_v34 = vshll.u32 %v137_v32, 23 }
  0x62   :  { %v139_v36 = vor.u32 4788187, %v138_v34  ;;  %v142_v37 = vcvt.s32.f32 %v135_v33 }
  0x64   :  { %v140_v38 = vand.u32 2147483647, %v139_v36 }
  0x66   :  { %v143_v39 = vmul.f32 %v142_v37, %v140_v38 }
  0x68   :  { %v144_v41 = vxor.u32 2147483648, %v143_v39 }
  0x6a   :  { %v145_v42 = vsel %vm62_vm7, %v144_v41, %v143_v39 }
  0x6b   :  { %v148_v44 = vsel %vm61_vm8, %v359_v20, %v145_v42 }
  0x6c   :  { %333 = vcosq.f32 %v148_v44 }
  0x6d   :  { %335 = vsinq.f32 %v148_v44 }
  0x76   :  { %v334_v49 = vpop.eup %333 }
  0x77   :  { %v336_v51 = vpop.eup %335  ;;  %v159_v24 = vxor.u32 2147483648, %v334_v49 }
  0x78   :  { %v156_v53 = vxor.u32 2147483648, %v336_v51 }
  0x79   :  { %v160_v54 = vsel %vm158_vm11, %v159_v24, %v336_v51 }
  0x7a   :  { %v157_v56 = vsel %vm155_vm12, %v334_v49, %v156_v53 }
  0x7b   :  { %v161_v57 = vsel %vm154_vm13, %v157_v56, %v160_v54 }
  0x7c   :  { %v162_v58 = vsel %vm152_vm14, nan, %v161_v57 }
  0x7d   :  { %v163_v59 = vmul.f32 %v162_v58, %v58_v55 }
  0x7f   :  { %164 = vst [vmem:[#allocation3] sm:$0xff] %v163_v59 }
  0x86   :  { %v288_v60 = vld [vmem:[#allocation3] sm:$0x3] }
  0x87   :  { %289 = vst [vmem:[%s385_s1] sm:$0x3] %v288_v60 }

</bundles_post_ra>
